<compile_context>
chip_gen: v6e
topology: v6e:2x2x1
jax: 0.10.0
libtpu: 0.0.40
codegen_flags: <defaults>
</compile_context>

<pallas_src>
import functools

import jax
import jax.numpy as jnp
from jax.experimental import pallas as pl
from jax.experimental.pallas import tpu as pltpu

_EPS = 1e-5  # nn.InstanceNorm2d default eps (affine=False, biased variance)


def _round_up(a, b):
    return ((a + b - 1) // b) * b


def _vmem_budget():
    """Return (per-block byte budget, vmem_limit_bytes), generation aware."""
    try:
        cap = pltpu.get_tpu_info().vmem_capacity_bytes
    except Exception:
        cap = 64 * 1024 * 1024  # conservative (v7x-sized) fallback
    if cap >= 100 * 1024 * 1024:  # v5e / v6e: 128 MiB physical VMEM
        return 12 * 1024 * 1024, 100 * 1024 * 1024
    # v7x: 64 MiB per TensorCore -> tighter block accounting.
    return 8 * 1024 * 1024, 48 * 1024 * 1024


def _choose_row_tile(r, row_bytes, block_budget):
    """Pick row tile TR (multiple of 8).

    Live VMEM per step ~= 2*(input block) + 2*(output block), so the budget is
    applied per block.  Preference: multi-step grid (pipelining) > even grid
    count (v7x dual-TC balance) > largest tile (fewest per-step overheads).
    """
    max_tr = (block_budget // max(row_bytes, 1)) // 8 * 8
    max_tr = max(8, min(max_tr, _round_up(r, 8)))
    best_tr, best_score = 8, None
    for tr in range(max_tr, 7, -8):
        grid = -(-r // tr)  # cdiv
        multi = grid >= 2
        balanced = (grid % 2 == 0) or grid == 1
        score = (multi, balanced, tr)
        if best_score is None or score > best_score:
            best_score, best_tr = score, tr
    return best_tr


def _adain_kernel(x_ref, fb_ref, o_ref, *, inv_hw, tr):
    # x_ref : (TR, HW) block of flattened (sample, channel) instances.
    # fb_ref: (R_pad, 2) resident [factor, bias] table; slice this step's rows
    #         in-kernel instead of DMAing a tiny block every grid step.
    # o_ref : (TR, HW) output block.  Rows past the true row count (last grid
    #         step over-run) are garbage but their stores are masked by Pallas.
    row0 = pl.multiple_of(pl.program_id(0) * tr, 8)
    fb = fb_ref[pl.ds(row0, tr), :]
    factor = fb[:, 0:1]
    bias = fb[:, 1:2]

    # Stats accumulated in f32 (VPU); lane axis == full HW so no padding lanes
    # ever enter the sums and inv_hw is the true 1/HW.
    xf = x_ref[...].astype(jnp.float32)
    s = jnp.sum(xf, axis=-1, keepdims=True)
    s2 = jnp.sum(xf * xf, axis=-1, keepdims=True)
    mean = s * inv_hw
    var = jnp.maximum(s2 * inv_hw - mean * mean, 0.0)  # biased, like InstanceNorm2d

    scale = factor * jax.lax.rsqrt(var + _EPS)  # EUP rsqrt
    shift = bias - mean * scale
    # Re-read x for the store so a full-block f32 temporary need not stay live
    # for low-precision inputs (VMEM re-reads are nearly free; HBM-bound kernel).
    o_ref[...] = (x_ref[...].astype(jnp.float32) * scale + shift).astype(o_ref.dtype)


def adain(image, style):
    """image: (N, C, H, W); style: (N, 2C, 1, 1) or (N, 2C). Returns (N, C, H, W)."""
    N, C, H, W = image.shape
    R = N * C
    HW = H * W

    style2d = style.reshape(N, 2 * C)
    factor = style2d[:, :C].reshape(R, 1)
    bias = style2d[:, C:].reshape(R, 1)
    fb = jnp.concatenate([factor, bias], axis=1).astype(jnp.float32)  # (R, 2)

    x = image.reshape(R, HW)  # free metadata reshape; no HBM copy

    itemsize = jnp.dtype(image.dtype).itemsize
    block_budget, vmem_limit = _vmem_budget()
    TR = _choose_row_tile(R, HW * itemsize, block_budget)
    grid = pl.cdiv(R, TR)

    # The per-instance (factor, bias) table stays resident in VMEM; pad it to
    # grid*TR rows so the in-kernel dynamic slice never reads out of bounds.
    # (A few KiB at most -- the big image tensor is never padded or sliced.)
    R_fb = grid * TR
    if R_fb != R:
        fb = jnp.pad(fb, ((0, R_fb - R), (0, 0)))

    kernel = functools.partial(_adain_kernel, inv_hw=float(1.0 / HW), tr=TR)

    out = pl.pallas_call(
        kernel,
        out_shape=jax.ShapeDtypeStruct((R, HW), image.dtype),
        grid_spec=pltpu.PrefetchScalarGridSpec(
            num_scalar_prefetch=0,
            grid=(grid,),
            in_specs=[
                # Full HW extent in the lane axis: legal even when HW % 128 != 0
                # (block dim == array dim); keeps the per-row stats exact and
                # avoids any wrapper-side pad/slice HBM round trip.
                pl.BlockSpec((TR, HW), lambda i: (i, 0)),
                # Whole fb array, same block every step -> loaded once, resident.
                pl.BlockSpec((R_fb, 2), lambda i: (0, 0)),
            ],
            out_specs=pl.BlockSpec((TR, HW), lambda i: (i, 0)),
        ),
        compiler_params=pltpu.CompilerParams(
            dimension_semantics=("parallel",),
            vmem_limit_bytes=vmem_limit,
        ),
        cost_estimate=pl.CostEstimate(
            flops=5 * R * HW,
            transcendentals=R,
            bytes_accessed=2 * R * HW * itemsize + R_fb * 2 * 4,
        ),
    )(x, fb)

    return out.reshape(N, C, H, W)


def _adain_ref(image, style):
    N, C, H, W = image.shape
    style2d = style.reshape(N, 2 * C)
    factor = style2d[:, :C].reshape(N, C, 1, 1)
    bias = style2d[:, C:].reshape(N, C, 1, 1)
    mean = jnp.mean(image, axis=(2, 3), keepdims=True)
    var = jnp.mean((image - mean) ** 2, axis=(2, 3), keepdims=True)
    normed = (image - mean) / jnp.sqrt(var + _EPS)
    return normed * factor + bias


if __name__ == "__main__":
    key = jax.random.PRNGKey(0)
    k_img, k_sty = jax.random.split(key)
    N, C, H, W = 2, 4, 16, 16
    image = jax.random.normal(k_img, (N, C, H, W), dtype=jnp.float32)
    style = jax.random.normal(k_sty, (N, 2 * C, 1, 1), dtype=jnp.float32)

    out = jax.block_until_ready(adain(image, style))
    ref = _adain_ref(image, style)
    assert out.shape == (N, C, H, W)
    assert jnp.max(jnp.abs(out - ref)) < 1e-4

    # Unaligned path: rows not a multiple of 8, HW not a multiple of 128
    # (exercises the masked row over-run + full-extent lane block, no padding).
    N2, C2, H2, W2 = 2, 3, 8, 8
    img2 = jax.random.normal(k_img, (N2, C2, H2, W2), dtype=jnp.float32)
    sty2 = jax.random.normal(k_sty, (N2, 2 * C2, 1, 1), dtype=jnp.float32)
    out2 = jax.block_until_ready(adain(img2, sty2))
    ref2 = _adain_ref(img2, sty2)
    assert jnp.max(jnp.abs(out2 - ref2)) < 1e-4

    print("KERNEL_OK")
</pallas_src>

<mosaic_0001>
module attributes {stable_mosaic.version = 11 : i64} {
  func.func @_adain_kernel(%arg0: i32, %arg1: memref<8x256xf32, #tpu.memory_space<vmem>>, %arg2: memref<8x2xf32, #tpu.memory_space<vmem>>, %arg3: memref<8x256xf32, #tpu.memory_space<vmem>>) attributes {dimension_semantics = [#tpu.dimension_semantics<parallel>], iteration_bounds = array<i64: 1>, scalar_prefetch = 0 : i64, scratch_operands = 0 : i64, tpu.core_type = #tpu.core_type<tc>, window_params = [{transform_indices = @transform_0, window_bounds = array<i64: 8, 256>}, {pipeline_mode = #tpu.pipeline_mode<synchronous>, transform_indices = @transform_1, window_bounds = array<i64: 8, 2>}, {transform_indices = @transform_2, window_bounds = array<i64: 8, 256>}]} {
    %c8_i32 = arith.constant 8 : i32
    %0 = arith.muli %arg0, %c8_i32 : i32
    %1 = tpu.assume_multiple %0, 8 : i32
    %2 = arith.index_cast %1 : i32 to index
    %c0 = arith.constant 0 : index
    %3 = vector.load %arg2[%2, %c0] : memref<8x2xf32, #tpu.memory_space<vmem>>, vector<8x2xf32>
    %4 = vector.extract_strided_slice %3 {offsets = [0, 0], sizes = [8, 1], strides = [1, 1]} : vector<8x2xf32> to vector<8x1xf32>
    %5 = vector.extract_strided_slice %3 {offsets = [0, 1], sizes = [8, 1], strides = [1, 1]} : vector<8x2xf32> to vector<8x1xf32>
    %c0_0 = arith.constant 0 : index
    %c0_1 = arith.constant 0 : index
    %6 = vector.load %arg1[%c0_0, %c0_1] : memref<8x256xf32, #tpu.memory_space<vmem>>, vector<8x256xf32>
    %cst = arith.constant dense<0.000000e+00> : vector<8xf32>
    %7 = vector.multi_reduction <add>, %6, %cst [1] : vector<8x256xf32> to vector<8xf32>
    %8 = vector.shape_cast %7 : vector<8xf32> to vector<8x1xf32>
    %9 = arith.mulf %6, %6 : vector<8x256xf32>
    %cst_2 = arith.constant dense<0.000000e+00> : vector<8xf32>
    %10 = vector.multi_reduction <add>, %9, %cst_2 [1] : vector<8x256xf32> to vector<8xf32>
    %11 = vector.shape_cast %10 : vector<8xf32> to vector<8x1xf32>
    %cst_3 = arith.constant 3.906250e-03 : f32
    %12 = vector.broadcast %cst_3 : f32 to vector<8x1xf32>
    %13 = arith.mulf %8, %12 : vector<8x1xf32>
    %cst_4 = arith.constant 3.906250e-03 : f32
    %14 = vector.broadcast %cst_4 : f32 to vector<8x1xf32>
    %15 = arith.mulf %11, %14 : vector<8x1xf32>
    %16 = arith.mulf %13, %13 : vector<8x1xf32>
    %17 = arith.subf %15, %16 : vector<8x1xf32>
    %cst_5 = arith.constant 0.000000e+00 : f32
    %18 = vector.broadcast %cst_5 : f32 to vector<8x1xf32>
    %19 = arith.maximumf %17, %18 : vector<8x1xf32>
    %cst_6 = arith.constant 9.99999974E-6 : f32
    %20 = vector.broadcast %cst_6 : f32 to vector<8x1xf32>
    %21 = arith.addf %19, %20 : vector<8x1xf32>
    %22 = math.rsqrt %21 : vector<8x1xf32>
    %23 = arith.mulf %4, %22 : vector<8x1xf32>
    %24 = arith.mulf %13, %23 : vector<8x1xf32>
    %25 = arith.subf %5, %24 : vector<8x1xf32>
    %c0_7 = arith.constant 0 : index
    %c0_8 = arith.constant 0 : index
    %26 = vector.load %arg1[%c0_7, %c0_8] : memref<8x256xf32, #tpu.memory_space<vmem>>, vector<8x256xf32>
    %27 = vector.broadcast %23 : vector<8x1xf32> to vector<8x256xf32>
    %28 = arith.mulf %26, %27 : vector<8x256xf32>
    %29 = vector.broadcast %25 : vector<8x1xf32> to vector<8x256xf32>
    %30 = arith.addf %28, %29 : vector<8x256xf32>
    %c0_9 = arith.constant 0 : index
    %c0_10 = arith.constant 0 : index
    %31 = vector.load %arg3[%c0_9, %c0_10] : memref<8x256xf32, #tpu.memory_space<vmem>>, vector<8x256xf32>
    tpu.vector_store %arg3[%c0_9, %c0_10], %30 {strides = array<i32>} : memref<8x256xf32, #tpu.memory_space<vmem>>, vector<8x256xf32>,
    return
  }
  func.func @transform_0(%arg0: i32) -> (i32, i32) {
    %c0_i32 = arith.constant 0 : i32
    %c0_i32_0 = arith.constant 0 : i32
    return %arg0, %c0_i32 : i32, i32
  }
  func.func @transform_1(%arg0: i32) -> (i32, i32) {
    %c0_i32 = arith.constant 0 : i32
    %c0_i32_0 = arith.constant 0 : i32
    %c0_i32_1 = arith.constant 0 : i32
    return %c0_i32, %c0_i32_0 : i32, i32
  }
  func.func @transform_2(%arg0: i32) -> (i32, i32) {
    %c0_i32 = arith.constant 0 : i32
    %c0_i32_0 = arith.constant 0 : i32
    return %arg0, %c0_i32 : i32, i32
  }
}

</mosaic_0001>

<bundles_post_ra>
// kernel: tpu_custom_call.1
= control target key start
LH: loop header
LB: loop body
LE: loop exit
PB: predicated region body
PF: predicated region fallthrough
CT: control target
= control target key end

     0   :  { %7 = vsyncpa [#allocation3], 0  ;;  %s164_s0 = inlined_call_operand.hbm [shape: f32[8,256], index: 0, kind: input, shape index: {}]   ;;  %s165_s1 = inlined_call_operand.vmem [shape: f32[8,2], index: 1, kind: input, shape index: {}]   ;;  %s166_s2 = inlined_call_operand.hbm [shape: f32[8,256], index: 2, kind: output, shape index: {}]  }
   0x1   :  { %8 = vsyncpa [#allocation4], 0  ;;  %s135_s9 = smov [#allocation2]  }
   0x2   :  { %s15_s10 = sshll.u32 %s135_s9, 4  ;;  %s16_s10 = int_to_ptr.vmem [resolvable:$true] %s15_s10 }
   0x3   :  { %s99_s11 = scalar_lea.vmem %s16_s10, 256  ;;  %p104_p1 = scmp.lt.s32.totalorder %s16_s10, %s16_s10 }
   0x4   :  { %p100_p0 = scmp.ne.s32.totalorder %s16_s10, %s99_s11  ;;  %p105_p2 = scmp.lt.s32.totalorder %s99_s11, %s99_s11 }
   0x6   :  { %p106_p3 = por %p105_p2, %p104_p1 }
   0x8   :  { %p107_p4 = pnand %p106_p3, %p100_p0 }
   0xa   :  { %110 = shalt.err (!%p107_p4)
}
   0xb   :  { %18 = dma.hbm_to_vmem [thread:$0]  %s164_s0, 256, %s16_s10, [#allocation3]  }
   0xc   :  { %131 = dma.done.wait [#allocation3], 256  }
   0xd   :  { %132 = vsyncadd [#allocation3], 4294967040  ;;  %v27_v0 = vld [vmem:[#allocation2] sm:$0xff]  ;;  %v28_v1 = vld [vmem:[#allocation2 + $0x8] sm:$0xff]  ;;  %v136_v6 = vmov 0   ;;  %v137_v15 = vmov 1  }
   0xe   :  { %v29_v2 = vadd.f32 %v28_v1, %v27_v0  ;;  %v32_v3 = vmul.f32 %v27_v0, %v27_v0  ;;  %v33_v4 = vmul.f32 %v28_v1, %v28_v1  ;;  %87 = vset.pattern.permute.xlu1 %v136_v6  ;;  %88 = vset.pattern.permute.xlu0 %v137_v15  ;;  %v26_v16 = vld [vmem:[%s165_s1] sm:$0xff]  ;;  %s138_s15 = smov 1   ;;  %s139_s16 = smov [#allocation5]  }
   0xf   :  { %s73_s17 = sshll.u32 %s139_s16, 4  ;;  %s74_s17 = int_to_ptr.vmem [resolvable:$true] %s73_s17 }
  0x10   :  { %30 = vadd.xlane.f32.xlu0 %v29_v2  ;;  %v34_v5 = vadd.f32 %v33_v4, %v32_v3  ;;  %s111_s1 = scalar_lea.vmem %s74_s17, 256  ;;  %p116_p6 = scmp.lt.s32.totalorder %s74_s17, %s74_s17 }
  0x11   :  { %p112_p5 = scmp.ne.s32.totalorder %s74_s17, %s111_s1  ;;  %p117_p7 = scmp.lt.s32.totalorder %s111_s1, %s111_s1 }
  0x13   :  { %p118_p8 = por %p117_p7, %p116_p6 }
  0x14   :  { %35 = vadd.xlane.f32.xlu0 %v34_v5 }
  0x15   :  { %p119_p9 = pnand %p118_p8, %p112_p5 }
  0x99   :  { %v31_v7 = vpop.xlane.xlu0 %30 }
  0x9a   :  { %v37_v8 = vmul.f32 0.00390625, %v31_v7 }
  0x9c   :  { %v39_v10 = vmul.f32 %v37_v8, %v37_v8 }
  0x9d   :  { %v36_v9 = vpop.xlane.xlu0 %35 }
  0x9e   :  { %v38_v11 = vmul.f32 0.00390625, %v36_v9 }
  0xa0   :  { %v40_v12 = vsub.f32 %v38_v11, %v39_v10 }
  0xa2   :  { %v41_v13 = vmax.f32 %v40_v12, 0.0 }
  0xa4   :  { %v42_v14 = vadd.f32 1e-05, %v41_v13 }
  0xa6   :  { %89 = vrsqrt.f32 %v42_v14 }
  0xb3   :  { %v90_v17 = vpop.eup %89 }
  0xb4   :  { %v44_v18 = vmul.f32 %v90_v17, %v26_v16 }
  0xb6   :  { %v45_v19 = vmul.f32 %v44_v18, %v37_v8 }
  0xb8   :  { %47 = vrot.lane.b32.xlu1 %v45_v19, %s138_s15 }
  0xbc   :  { %53 = vperm.xlu1 %87, %v44_v18  }
 0x12a   :  { %v48_v20 = vpop.permute.xlu1 %47 }
 0x12b   :  { %v50_v21 = vsub.f32 %v26_v16, %v48_v20 }
 0x12d   :  { %60 = vperm.xlu0 %88, %v50_v21  }
 0x137   :  { %v54_v22 = vpop.permute.xlu1 %53 }
 0x138   :  { %v56_v23 = vmul.f32 %v54_v22, %v27_v0  ;;  %v57_v24 = vmul.f32 %v54_v22, %v28_v1 }
 0x1a8   :  { %v61_v25 = vpop.permute.xlu0 %60 }
 0x1a9   :  { %v63_v26 = vadd.f32 %v61_v25, %v56_v23  ;;  %v64_v27 = vadd.f32 %v61_v25, %v57_v24 }
 0x1ab   :  { %65 = vst [vmem:[#allocation5] sm:$0xff] %v63_v26  ;;  %66 = vst [vmem:[#allocation5 + $0x8] sm:$0xff] %v64_v27 }
 0x1ac   :  { %122 = shalt.err (!%p119_p9)
}
 0x1ad   :  { %76 = dma.vmem_to_hbm [thread:$0]  %s74_s17, 256, %s166_s2, [#allocation4]  }
 0x1ae   :  { %133 = dma.done.wait [#allocation4], 256  }
 0x1af   :  { %134 = vsyncadd [#allocation4], 4294967040 }
 0x1b0   :  { %80 = vsyncpa [#allocation3], 1 }
 0x1b1   :  { %81 = vsyncpa [#allocation4], 1 }

</bundles_post_ra>
